<compile_context>
chip_gen: v7x
topology: tpu7x:2x2x1
jax: 0.10.0
libtpu: 0.0.40
codegen_flags: <defaults>
</compile_context>

<pallas_src>
import functools
import math

import jax
import jax.numpy as jnp
import numpy as np
from jax.experimental import pallas as pl
from jax.experimental.pallas import tpu as pltpu

_INV_SQRT2 = 0.7071067811865476
_BN_EPS = 1e-5
_VMEM_LIMIT = 32 * 1024 * 1024  # conservative: fits scoped VMEM on v5e/v6e/v7x


def _conv_gelu_kernel(x_ref, w_ref, b_ref, mask_ref, y_ref, sums_ref, *, wp, lw):
    """Pass 1: transposed conv (single K=9*Cin matmul) + bias + exact GELU + BN partial sums.

    x_ref    : (Cin, L)       bf16  one padded, flattened image (L = (H+5)*(W+4))
    w_ref    : (Cout, 9*Cin)  bf16  flipped conv weights (VMEM-resident across grid)
    b_ref    : (Cout, 1)      f32   conv bias (resident)
    mask_ref : (1, Lw)        f32   validity mask over the wide spatial axis (resident)
    y_ref    : (Cout, Lw)     f32   pre-BN activations for this image
    sums_ref : (Cout, 2)      f32   [sum, sum_sq] accumulated across the whole grid (resident)
    """
    n = pl.program_id(0)

    @pl.when(n == 0)
    def _init():
        sums_ref[...] = jnp.zeros_like(sums_ref)

    # In-kernel im2col: the 9 kernel taps are contiguous lane-offset slices of the
    # flattened padded image (no HBM duplication, slices stay in VMEM).
    taps = [x_ref[:, a * wp + b: a * wp + b + lw] for a in range(3) for b in range(3)]
    patches = jnp.concatenate(taps, axis=0)                       # (9*Cin, Lw) bf16

    # One MXU matmul, contraction K = 9*Cin, f32 accumulation.
    acc = jnp.dot(w_ref[...], patches,
                  preferred_element_type=jnp.float32)             # (Cout, Lw) f32
    y = acc + b_ref[...]

    # Exact (erf) GELU, matching torch.nn.GELU() default.
    y = 0.5 * y * (1.0 + jax.lax.erf(y * _INV_SQRT2))

    # Dropout2d: identity (see TODO at top).

    y_ref[...] = y

    # BatchNorm partial statistics (mask removes the 2 junk columns per wide row).
    m = mask_ref[...]
    psum = jnp.sum(y * m, axis=1, keepdims=True)                  # (Cout, 1)
    psumsq = jnp.sum(y * y * m, axis=1, keepdims=True)            # (Cout, 1)
    sums_ref[...] += jnp.concatenate([psum, psumsq], axis=1)      # (Cout, 2)


def _bn_apply_kernel(y_ref, sums_ref, g_ref, beta_ref, o_ref, *, count):
    """Pass 2: apply training-mode BatchNorm using globally accumulated sums."""
    inv_n = 1.0 / count
    s = sums_ref[...]                                             # (Cout, 2)
    mean = s[:, 0:1] * inv_n
    var = jnp.maximum(s[:, 1:2] * inv_n - mean * mean, 0.0)       # biased variance
    scale = g_ref[...] * jax.lax.rsqrt(var + _BN_EPS)
    shift = beta_ref[...] - mean * scale
    o_ref[...] = y_ref[...] * scale + shift


def deconv_block(x_nchw, weight, bias, gamma, beta):
    """Pallas implementation of deconvBlock.forward.

    x_nchw : (N, Cin, H, W) float32
    weight : (Cin, Cout, 3, 3) float32  (PyTorch ConvTranspose2d layout)
    bias, gamma, beta : (Cout,) float32
    returns: (N, Cout, H+2, W+2) float32
    """
    N, Cin, H, W = x_nchw.shape
    Cout = weight.shape[1]
    Ho, Wo = H + 2, W + 2      # ConvTranspose2d k=3 s=1 p=0 output size
    Wp = W + 4                 # wide row: Wo + 2 junk columns so all taps are contiguous slices
    Hp1 = H + 5                # pad 2 top / 3 bottom (spare row keeps the last tap slice in-bounds)
    L = Hp1 * Wp
    Lw = Ho * Wp
    KC = 9 * Cin

    # One padded, flattened bf16 copy of the input (no host-side 9x im2col duplication).
    x_pad = jnp.pad(x_nchw, ((0, 0), (0, 0), (2, 3), (2, 2)))
    x_flat = x_pad.reshape(N, Cin, L).astype(jnp.bfloat16)

    # Flipped correlation weights; K-axis ordered (a, b, ci) to match the in-kernel concat.
    w_corr = jnp.transpose(weight[:, :, ::-1, ::-1], (2, 3, 0, 1))   # (3, 3, Cin, Cout)
    w2 = w_corr.reshape(KC, Cout).T.astype(jnp.bfloat16)             # (Cout, 9*Cin)

    bias2 = bias.reshape(Cout, 1).astype(jnp.float32)
    gamma2 = gamma.reshape(Cout, 1).astype(jnp.float32)
    beta2 = beta.reshape(Cout, 1).astype(jnp.float32)

    # Validity mask over the wide spatial axis (last 2 columns of each wide row are junk).
    cols = np.arange(Lw) % Wp
    mask = jnp.asarray((cols < Wo).astype(np.float32).reshape(1, Lw))

    kern1 = functools.partial(_conv_gelu_kernel, wp=Wp, lw=Lw)
    y_wide, sums = pl.pallas_call(
        kern1,
        grid=(N,),
        in_specs=[
            pl.BlockSpec((None, Cin, L), lambda n: (n, 0, 0)),    # per-image activation tile
            pl.BlockSpec((Cout, KC), lambda n: (0, 0)),           # resident weights
            pl.BlockSpec((Cout, 1), lambda n: (0, 0)),            # resident bias
            pl.BlockSpec((1, Lw), lambda n: (0, 0)),              # resident mask
        ],
        out_specs=[
            pl.BlockSpec((None, Cout, Lw), lambda n: (n, 0, 0)),  # pre-BN activations
            pl.BlockSpec((Cout, 2), lambda n: (0, 0)),            # resident BN accumulator
        ],
        out_shape=[
            jax.ShapeDtypeStruct((N, Cout, Lw), jnp.float32),
            jax.ShapeDtypeStruct((Cout, 2), jnp.float32),
        ],
        compiler_params=pltpu.CompilerParams(
            dimension_semantics=("arbitrary",),   # sums accumulated across the grid
            vmem_limit_bytes=_VMEM_LIMIT),
    )(x_flat, w2, bias2, mask)

    count = float(N * Ho * Wo)
    kern2 = functools.partial(_bn_apply_kernel, count=count)
    out_wide = pl.pallas_call(
        kern2,
        grid=(N,),
        in_specs=[
            pl.BlockSpec((None, Cout, Lw), lambda n: (n, 0, 0)),
            pl.BlockSpec((Cout, 2), lambda n: (0, 0)),
            pl.BlockSpec((Cout, 1), lambda n: (0, 0)),
            pl.BlockSpec((Cout, 1), lambda n: (0, 0)),
        ],
        out_specs=pl.BlockSpec((None, Cout, Lw), lambda n: (n, 0, 0)),
        out_shape=jax.ShapeDtypeStruct((N, Cout, Lw), jnp.float32),
        compiler_params=pltpu.CompilerParams(
            dimension_semantics=("parallel",),
            vmem_limit_bytes=_VMEM_LIMIT),
    )(y_wide, sums, gamma2, beta2)

    # Drop the 2 junk columns of each wide row; result is already NCHW.
    return out_wide.reshape(N, Cout, Ho, Wp)[:, :, :, :Wo]


def _reference(x_nchw, weight, bias, gamma, beta):
    """Pure-JAX f32 reference (independent conv path via lax.conv_general_dilated)."""
    w_corr = jnp.transpose(weight[:, :, ::-1, ::-1], (1, 0, 2, 3))  # (Cout, Cin, 3, 3)
    y = jax.lax.conv_general_dilated(
        x_nchw, w_corr, window_strides=(1, 1), padding=((2, 2), (2, 2)),
        dimension_numbers=("NCHW", "OIHW", "NCHW"))
    y = y + bias[None, :, None, None]
    y = 0.5 * y * (1.0 + jax.lax.erf(y * _INV_SQRT2))
    mean = jnp.mean(y, axis=(0, 2, 3), keepdims=True)
    var = jnp.mean((y - mean) ** 2, axis=(0, 2, 3), keepdims=True)
    return (y - mean) * jax.lax.rsqrt(var + _BN_EPS) * gamma[None, :, None, None] \
        + beta[None, :, None, None]


if __name__ == "__main__":
    key = jax.random.PRNGKey(0)
    k1, k2, k3, k4, k5 = jax.random.split(key, 5)

    N, Cin, H, W = 2, 4, 16, 16
    Cout = 8

    x = jax.random.normal(k1, (N, Cin, H, W), jnp.float32)

    # ConvTranspose2d weight (Cin, Cout, 3, 3), kaiming_normal_: std = sqrt(2 / fan_in),
    # PyTorch fan_in for this layout = Cout * 3 * 3.
    std = math.sqrt(2.0 / (Cout * 3 * 3))
    weight = jax.random.normal(k2, (Cin, Cout, 3, 3), jnp.float32) * std
    bias = 0.1 * jax.random.normal(k3, (Cout,), jnp.float32)
    gamma = 1.0 + 0.1 * jax.random.normal(k4, (Cout,), jnp.float32)
    beta = 0.1 * jax.random.normal(k5, (Cout,), jnp.float32)

    out = deconv_block(x, weight, bias, gamma, beta)
    out = jax.block_until_ready(out)
    assert out.shape == (N, Cout, H + 2, W + 2), out.shape

    ref = jax.block_until_ready(_reference(x, weight, bias, gamma, beta))
    # bf16 matmul operands (f32 accumulation) -> allow slightly looser tolerance than pure f32.
    if not np.allclose(np.asarray(out), np.asarray(ref), atol=2e-2, rtol=2e-2):
        err = np.max(np.abs(np.asarray(out) - np.asarray(ref)))
        raise AssertionError(f"Pallas kernel does not match reference (max abs err {err})")

    print("KERNEL_OK")
</pallas_src>

<mosaic_0001>
module attributes {stable_mosaic.version = 11 : i64} {
  func.func @_conv_gelu_kernel(%arg0: i32, %arg1: memref<1x4x420xbf16, #tpu.memory_space<vmem>>, %arg2: memref<8x36xbf16, #tpu.memory_space<vmem>>, %arg3: memref<8x1xf32, #tpu.memory_space<vmem>>, %arg4: memref<1x360xf32, #tpu.memory_space<vmem>>, %arg5: memref<1x8x360xf32, #tpu.memory_space<vmem>>, %arg6: memref<8x2xf32, #tpu.memory_space<vmem>>) attributes {dimension_semantics = [#tpu.dimension_semantics<arbitrary>], iteration_bounds = array<i64: 2>, scalar_prefetch = 0 : i64, scratch_operands = 0 : i64, tpu.core_type = #tpu.core_type<tc>, window_params = [{transform_indices = @transform_0, window_bounds = array<i64: 1, 4, 420>}, {pipeline_mode = #tpu.pipeline_mode<synchronous>, transform_indices = @transform_1, window_bounds = array<i64: 8, 36>}, {pipeline_mode = #tpu.pipeline_mode<synchronous>, transform_indices = @transform_2, window_bounds = array<i64: 8, 1>}, {pipeline_mode = #tpu.pipeline_mode<synchronous>, transform_indices = @transform_3, window_bounds = array<i64: 1, 360>}, {transform_indices = @transform_4, window_bounds = array<i64: 1, 8, 360>}, {pipeline_mode = #tpu.pipeline_mode<synchronous>, transform_indices = @transform_5, window_bounds = array<i64: 8, 2>}]} {
    %c0_i32 = arith.constant 0 : i32
    %0 = arith.cmpi eq, %arg0, %c0_i32 : i32
    %1 = arith.extui %0 : i1 to i32
    %c0_i32_0 = arith.constant 0 : i32
    %2 = arith.cmpi ne, %1, %c0_i32_0 : i32
    scf.if %2 {
      %cst_37 = arith.constant 0.000000e+00 : f32
      %52 = vector.broadcast %cst_37 : f32 to vector<8x2xf32>
      %c0_38 = arith.constant 0 : index
      %c0_39 = arith.constant 0 : index
      %53 = vector.load %arg6[%c0_38, %c0_39] : memref<8x2xf32, #tpu.memory_space<vmem>>, vector<8x2xf32>
      tpu.vector_store %arg6[%c0_38, %c0_39], %52 {strides = array<i32>} : memref<8x2xf32, #tpu.memory_space<vmem>>, vector<8x2xf32>,
    } else {
    }
    %c0 = arith.constant 0 : index
    %c0_1 = arith.constant 0 : index
    %c0_2 = arith.constant 0 : index
    %3 = vector.load %arg1[%c0, %c0_1, %c0_2] : memref<1x4x420xbf16, #tpu.memory_space<vmem>>, vector<1x4x360xbf16>
    %4 = vector.shape_cast %3 : vector<1x4x360xbf16> to vector<4x360xbf16>
    %c0_3 = arith.constant 0 : index
    %c0_4 = arith.constant 0 : index
    %c1 = arith.constant 1 : index
    %5 = vector.load %arg1[%c0_3, %c0_4, %c1] : memref<1x4x420xbf16, #tpu.memory_space<vmem>>, vector<1x4x360xbf16>
    %6 = vector.shape_cast %5 : vector<1x4x360xbf16> to vector<4x360xbf16>
    %c0_5 = arith.constant 0 : index
    %c0_6 = arith.constant 0 : index
    %c2 = arith.constant 2 : index
    %7 = vector.load %arg1[%c0_5, %c0_6, %c2] : memref<1x4x420xbf16, #tpu.memory_space<vmem>>, vector<1x4x360xbf16>
    %8 = vector.shape_cast %7 : vector<1x4x360xbf16> to vector<4x360xbf16>
    %c0_7 = arith.constant 0 : index
    %c0_8 = arith.constant 0 : index
    %c20 = arith.constant 20 : index
    %9 = vector.load %arg1[%c0_7, %c0_8, %c20] : memref<1x4x420xbf16, #tpu.memory_space<vmem>>, vector<1x4x360xbf16>
    %10 = vector.shape_cast %9 : vector<1x4x360xbf16> to vector<4x360xbf16>
    %c0_9 = arith.constant 0 : index
    %c0_10 = arith.constant 0 : index
    %c21 = arith.constant 21 : index
    %11 = vector.load %arg1[%c0_9, %c0_10, %c21] : memref<1x4x420xbf16, #tpu.memory_space<vmem>>, vector<1x4x360xbf16>
    %12 = vector.shape_cast %11 : vector<1x4x360xbf16> to vector<4x360xbf16>
    %c0_11 = arith.constant 0 : index
    %c0_12 = arith.constant 0 : index
    %c22 = arith.constant 22 : index
    %13 = vector.load %arg1[%c0_11, %c0_12, %c22] : memref<1x4x420xbf16, #tpu.memory_space<vmem>>, vector<1x4x360xbf16>
    %14 = vector.shape_cast %13 : vector<1x4x360xbf16> to vector<4x360xbf16>
    %c0_13 = arith.constant 0 : index
    %c0_14 = arith.constant 0 : index
    %c40 = arith.constant 40 : index
    %15 = vector.load %arg1[%c0_13, %c0_14, %c40] : memref<1x4x420xbf16, #tpu.memory_space<vmem>>, vector<1x4x360xbf16>
    %16 = vector.shape_cast %15 : vector<1x4x360xbf16> to vector<4x360xbf16>
    %c0_15 = arith.constant 0 : index
    %c0_16 = arith.constant 0 : index
    %c41 = arith.constant 41 : index
    %17 = vector.load %arg1[%c0_15, %c0_16, %c41] : memref<1x4x420xbf16, #tpu.memory_space<vmem>>, vector<1x4x360xbf16>
    %18 = vector.shape_cast %17 : vector<1x4x360xbf16> to vector<4x360xbf16>
    %c0_17 = arith.constant 0 : index
    %c0_18 = arith.constant 0 : index
    %c42 = arith.constant 42 : index
    %19 = vector.load %arg1[%c0_17, %c0_18, %c42] : memref<1x4x420xbf16, #tpu.memory_space<vmem>>, vector<1x4x360xbf16>
    %20 = vector.shape_cast %19 : vector<1x4x360xbf16> to vector<4x360xbf16>
    %21 = tpu.concatenate %4, %6, %8, %10, %12, %14, %16, %18, %20 in 0 : vector<4x360xbf16>, vector<4x360xbf16>, vector<4x360xbf16>, vector<4x360xbf16>, vector<4x360xbf16>, vector<4x360xbf16>, vector<4x360xbf16>, vector<4x360xbf16>, vector<4x360xbf16> -> vector<36x360xbf16>
    %c0_19 = arith.constant 0 : index
    %c0_20 = arith.constant 0 : index
    %22 = vector.load %arg2[%c0_19, %c0_20] : memref<8x36xbf16, #tpu.memory_space<vmem>>, vector<8x36xbf16>
    %cst = arith.constant dense<0.000000e+00> : vector<8x360xf32>
    %23 = tpu.matmul %22, %21, %cst {dimension_numbers = #tpu.dot_dimension_numbers<[1], [0], [0], [1], [0, 0, 1, 1], [], []>} : vector<8x36xbf16>, vector<36x360xbf16>, vector<8x360xf32> -> vector<8x360xf32>
    %c0_21 = arith.constant 0 : index
    %c0_22 = arith.constant 0 : index
    %24 = vector.load %arg3[%c0_21, %c0_22] : memref<8x1xf32, #tpu.memory_space<vmem>>, vector<8x1xf32>
    %25 = vector.broadcast %24 : vector<8x1xf32> to vector<8x360xf32>
    %26 = arith.addf %23, %25 : vector<8x360xf32>
    %cst_23 = arith.constant 5.000000e-01 : f32
    %27 = vector.broadcast %cst_23 : f32 to vector<8x360xf32>
    %28 = arith.mulf %27, %26 : vector<8x360xf32>
    %cst_24 = arith.constant 0.707106769 : f32
    %29 = vector.broadcast %cst_24 : f32 to vector<8x360xf32>
    %30 = arith.mulf %26, %29 : vector<8x360xf32>
    %31 = math.erf %30 : vector<8x360xf32>
    %cst_25 = arith.constant 1.000000e+00 : f32
    %32 = vector.broadcast %cst_25 : f32 to vector<8x360xf32>
    %33 = arith.addf %32, %31 : vector<8x360xf32>
    %34 = arith.mulf %28, %33 : vector<8x360xf32>
    %c0_26 = arith.constant 0 : index
    %c0_27 = arith.constant 0 : index
    %c0_28 = arith.constant 0 : index
    %35 = vector.load %arg5[%c0_26, %c0_27, %c0_28] : memref<1x8x360xf32, #tpu.memory_space<vmem>>, vector<1x8x360xf32>
    %36 = vector.shape_cast %35 : vector<1x8x360xf32> to vector<8x360xf32>
    %37 = vector.shape_cast %34 : vector<8x360xf32> to vector<1x8x360xf32>
    tpu.vector_store %arg5[%c0_26, %c0_27, %c0_28], %37 {strides = array<i32>} : memref<1x8x360xf32, #tpu.memory_space<vmem>>, vector<1x8x360xf32>,
    %c0_29 = arith.constant 0 : index
    %c0_30 = arith.constant 0 : index
    %38 = vector.load %arg4[%c0_29, %c0_30] : memref<1x360xf32, #tpu.memory_space<vmem>>, vector<1x360xf32>
    %39 = vector.broadcast %38 : vector<1x360xf32> to vector<8x360xf32>
    %40 = arith.mulf %34, %39 : vector<8x360xf32>
    %cst_31 = arith.constant dense<0.000000e+00> : vector<8xf32>
    %41 = vector.multi_reduction <add>, %40, %cst_31 [1] : vector<8x360xf32> to vector<8xf32>
    %42 = vector.shape_cast %41 : vector<8xf32> to vector<8x1xf32>
    %43 = arith.mulf %34, %34 : vector<8x360xf32>
    %44 = vector.broadcast %38 : vector<1x360xf32> to vector<8x360xf32>
    %45 = arith.mulf %43, %44 : vector<8x360xf32>
    %cst_32 = arith.constant dense<0.000000e+00> : vector<8xf32>
    %46 = vector.multi_reduction <add>, %45, %cst_32 [1] : vector<8x360xf32> to vector<8xf32>
    %47 = vector.shape_cast %46 : vector<8xf32> to vector<8x1xf32>
    %c0_33 = arith.constant 0 : index
    %c0_34 = arith.constant 0 : index
    %48 = vector.load %arg6[%c0_33, %c0_34] : memref<8x2xf32, #tpu.memory_space<vmem>>, vector<8x2xf32>
    %49 = tpu.concatenate %42, %47 in 1 : vector<8x1xf32>, vector<8x1xf32> -> vector<8x2xf32>
    %50 = arith.addf %48, %49 : vector<8x2xf32>
    %c0_35 = arith.constant 0 : index
    %c0_36 = arith.constant 0 : index
    %51 = vector.load %arg6[%c0_35, %c0_36] : memref<8x2xf32, #tpu.memory_space<vmem>>, vector<8x2xf32>
    tpu.vector_store %arg6[%c0_35, %c0_36], %50 {strides = array<i32>} : memref<8x2xf32, #tpu.memory_space<vmem>>, vector<8x2xf32>,
    return
  }
  func.func @transform_0(%arg0: i32) -> (i32, i32, i32) {
    %c0_i32 = arith.constant 0 : i32
    %c0_i32_0 = arith.constant 0 : i32
    %c0_i32_1 = arith.constant 0 : i32
    return %arg0, %c0_i32, %c0_i32_0 : i32, i32, i32
  }
  func.func @transform_1(%arg0: i32) -> (i32, i32) {
    %c0_i32 = arith.constant 0 : i32
    %c0_i32_0 = arith.constant 0 : i32
    %c0_i32_1 = arith.constant 0 : i32
    return %c0_i32, %c0_i32_0 : i32, i32
  }
  func.func @transform_2(%arg0: i32) -> (i32, i32) {
    %c0_i32 = arith.constant 0 : i32
    %c0_i32_0 = arith.constant 0 : i32
    %c0_i32_1 = arith.constant 0 : i32
    return %c0_i32, %c0_i32_0 : i32, i32
  }
  func.func @transform_3(%arg0: i32) -> (i32, i32) {
    %c0_i32 = arith.constant 0 : i32
    %c0_i32_0 = arith.constant 0 : i32
    %c0_i32_1 = arith.constant 0 : i32
    return %c0_i32, %c0_i32_0 : i32, i32
  }
  func.func @transform_4(%arg0: i32) -> (i32, i32, i32) {
    %c0_i32 = arith.constant 0 : i32
    %c0_i32_0 = arith.constant 0 : i32
    %c0_i32_1 = arith.constant 0 : i32
    return %arg0, %c0_i32, %c0_i32_0 : i32, i32, i32
  }
  func.func @transform_5(%arg0: i32) -> (i32, i32) {
    %c0_i32 = arith.constant 0 : i32
    %c0_i32_0 = arith.constant 0 : i32
    %c0_i32_1 = arith.constant 0 : i32
    return %c0_i32, %c0_i32_0 : i32, i32
  }
}

</mosaic_0001>

<bundles_post_ra>
// kernel: tpu_custom_call.1
= control target key start
LH: loop header
LB: loop body
LE: loop exit
PB: predicated region body
PF: predicated region fallthrough
CT: control target
= control target key end

     0   :  { %11 = vsyncpa [#allocation3], 0  ;;  %s1180_s0 = inlined_call_operand.hbm [shape: bf16[2,4,420], index: 0, kind: input, shape index: {}]   ;;  %s1181_s1 = inlined_call_operand.vmem [shape: bf16[8,36], index: 1, kind: input, shape index: {}]   ;;  %s1182_s2 = inlined_call_operand.vmem [shape: f32[8,1], index: 2, kind: input, shape index: {}]   ;;  %s1183_s3 = inlined_call_operand.vmem [shape: f32[1,360], index: 3, kind: input, shape index: {}]   ;;  %s1184_s4 = inlined_call_operand.hbm [shape: f32[2,8,360], index: 4, kind: output, shape index: {0}]   ;;  %s1185_s5 = inlined_call_operand.vmem [shape: f32[8,2], index: 5, kind: output, shape index: {1}]  }
   0x1   :  { %13 = vsyncpa [#allocation3 + $0x1], 0 }
   0x2   :  { %14 = vsyncpa [#allocation4], 0 }
   0x3   :  { %16 = vsyncpa [#allocation4 + $0x1], 0  ;;  %s937_s18 = smov 0   ;;  %s939_s19 = smov 0  }
   0x4   :  { %s941_s20 = smov 0   ;;  %s943_s21 = smov 0  }
   0x5 LB: > { %s958_s22 = sadd.s32 4294967295, %s890_s21   ;;  %s691_s23 = sadd.s32 4294967294, %s890_s21   ;;  %s890_s21 = sphi %s943_s21, %s1200_s21   ;;  %s886_s20 = sphi %s941_s20, %s1199_s20   ;;  %s882_s19 = sphi %s939_s19, %s1198_s19   ;;  %s878_s18 = sphi %s937_s18, %s1197_s18  }
   0x6   : > { %s962_s24 = sadd.s32 1, %s890_s21   ;;  %s29_s25 = sadd.s32 1, %s886_s20 }
   0x7   : > { %s26_s26 = ssub.s32 %s890_s21, %s962_s24  ;;  %p36_p0 = scmp.ne.s32.totalorder %s886_s20, %s882_s19 }
   0x8   : > { %p27_p1 = scmp.eq.s32.totalorder %s26_s26, 0  ;;  %p37_p2 = scmp.eq.s32.totalorder %s890_s21, 0 }
   0x9   : > { %p42_p3 = scmp.ne.s32.totalorder %s882_s19, %s878_s18  ;;  %p43_p4 = scmp.eq.s32.totalorder %s958_s22, 0 }
   0xa   : > { %s974_s27 = scalar_select %p27_p1, %s886_s20, %s29_s25  }
   0xb   : > { %p976_p5 = por %p37_p2, %p36_p0  ;;  %p980_p6 = por %p43_p4, %p42_p3 }
   0xc   : > { %p129_p7 = scmp.eq.s32.totalorder %s958_s22, 1  ;;  %p135_p8 = scmp.eq.s32.totalorder %s691_s23, 1 }
   0xd   : > { %p735_p10 = scmp.lt.s32.totalorder %s890_s21, 2  ;;  %s185_s7 = sand.u32 1, %s886_s20  }
   0xe   : > { %p987_p11 = por %p129_p7, %p36_p0  ;;  %p991_p12 = por %p135_p8, %p42_p3 }
   0xf   : > { %s706_s8 = sshll.u32 %s890_s21, 7  ;;  %s694_s9 = sshll.u32 %s185_s7, 3 }
  0x10   : > { %s1189_s30 = scalar_select %p987_p11, 1, 0 }
  0x11   : > { %s1190_s6 = scalar_select %p991_p12, 1, 0 }
  0x12   : > { %s1000_s12 = scalar_lea.hbm %s1180_s0, %s706_s8  ;;  %s189_s13 = scalar_lea.vmem [#allocation2], %s694_s9 }
  0x13   : > { %s197_s14 = sshll.u32 %s189_s13, 4  ;;  %p1004_p13 = pnand %p735_p10, %p976_p5  ;;  %s1008_s14 = int_to_ptr.vmem [resolvable:$true] %s197_s14 }
  0x14   : > { %s186_s16 = scalar_lea.sflag [#allocation3], %s185_s7  ;;  %s794_s17 = scalar_lea.hbm %s1000_s12, 128 }
  0x15   : > { %p795_p2 = scmp.ne.s32.totalorder %s1000_s12, %s794_s17  ;;  %p796_p3 = pneg %p1004_p13 }
  0x16   : > { %s799_s26 = scalar_lea.hbm %s1180_s0, 256  ;;  %p800_p5 = scmp.lt.u32.totalorder %s1000_s12, %s1180_s0 }
  0x17   : > { %p797_p4 = pnand %p796_p3, %p795_p2  ;;  %p801_p8 = scmp.lt.u32.totalorder %s799_s26, %s794_s17 }
  0x18   : > { %p803_p9 = scmp.lt.u32.totalorder %s794_s17, %s1000_s12 }
  0x19   : > { %p798_p7 = pneg %p797_p4  ;;  %p802_p10 = por %p801_p8, %p800_p5 }
  0x1b   : > { %p804_p0 = por %p803_p9, %p802_p10 }
  0x1d   : > { %p805_p1 = pnand %p804_p0, %p798_p7 }
  0x1f   : > { %808 = shalt.err (!%p805_p1)
}
  0x20   : > { %s809_s7 = scalar_lea.vmem %s1008_s14, 128  ;;  %s892_s9 = smov [#allocation2]  }
  0x21   : > { %p810_p2 = scmp.ne.s32.totalorder %s1008_s14, %s809_s7  ;;  %s814_s10 = sshll.u32 %s892_s9, 4  ;;  %s815_s10 = int_to_ptr.vmem [resolvable:$false] %s814_s10 }
  0x22   : > { %s816_s11 = scalar_lea.vmem %s815_s10, 256  ;;  %p817_p11 = scmp.lt.s32.totalorder %s1008_s14, %s815_s10 }
  0x23   : > { %p812_p4 = pnand %p810_p2, %p796_p3  ;;  %p818_p5 = scmp.lt.s32.totalorder %s816_s11, %s809_s7 }
  0x25   : > { %p813_p12 = pneg %p812_p4  ;;  %p819_p8 = por %p818_p5, %p817_p11 }
  0x27   : > { %p820_p9 = pnand %p819_p8, %p813_p12 }
  0x29   : > { %823 = shalt.err (!%p820_p9)
}
  0x2a   : > { %730 = dma.hbm_to_vmem [thread:$0]  (!%p1004_p13), %s1000_s12, 128, %s1008_s14, %s186_s16  }
  0x2b   : > { %p1192_p0 = scmp.lt.s32.totalorder %s890_s21, 3  ;;  %p1193_p1 = scmp.ge.s32.totalorder %s890_s21, 1 }
  0x2d   : > { %p203_p3 = pnand %p1193_p1, %p1192_p0 }
  0x2e   : > { %s1042_s13 = sand.u32 (!%p203_p3), 1, %s882_s19  }
  0x2f   : > { %206 = sbr.rel (%p203_p3) target bundleno = 629 (0x275), region = 36  ;;  %s698_s17 = sshll.u32 (!%p203_p3), %s1042_s13, 3 }
  0x30   : > { %s209_s23 = scalar_lea.sflag (!%p203_p3), [#allocation3], %s1042_s13  ;;  %s1046_s25 = scalar_lea.vmem (!%p203_p3), [#allocation2], %s698_s17 }
  0x36   : > { %869 = dma.done.wait (%p980_p6), %s209_s23, 128  }
  0x37   : > { %871 = vsyncadd (%p980_p6), %s209_s23, 4294967168  ;;  %s721_s12 = smul.u32 24, %s1042_s13  ;;  %p699_p11 = scmp.ne.s32.totalorder %s958_s22, 0 }
  0x38   : > { %vm244_vm0 = vcmask (!%p699_p11), 15360   ;;  %v893_v0 = vmov (!%p699_p11), 0.0  }
  0x39   : > { %s1053_s14 = scalar_lea.vmem [#allocation5], %s721_s12  ;;  %243 = sbr.rel (%p699_p11) target bundleno = 64 (0x40), region = 44  ;;  %245 = vst.msk [vmem:[%s1185_s5] sm:$0xff] (!%p699_p11), %vm244_vm0, %v893_v0 }
  0x40 PF: > { %v246_v1 = vld [vmem:[%s1046_s25] sm:$0x3f]  ;;  %v253_v2 = vlaneseq  ;;  %v894_v3 = vmov 1983009808   ;;  %s895_s29 = smov 127   ;;  %v896_v14 = vmov 0.0  }
  0x41   : > { %v251_v4 = vunpack.c.l.s4 %v894_v3  ;;  %v265_v7 = vcombine.low %v246_v1, %v246_v1  ;;  %v249_v9 = vcombine.high %v246_v1, %v246_v1  ;;  %711 = vmatprep.subr.bf16.mxu1 %v896_v14  ;;  %s897_s26 = smov 126   ;;  %s898_s28 = smov 108   ;;  %v247_v19 = vld [vmem:[%s1046_s25] sm:$0xff]  ;;  %v903_v28 = vmov 0  }
  0x42   : > { %v1060_v5 = vshrl.u32 %v253_v2, 7  ;;  %s899_s8 = smov 107   ;;  %s900_s7 = smov 106   ;;  %v323_v20 = vcombine.high %v247_v19, %v247_v19  ;;  %v352_v25 = vcombine.low %v247_v19, %v247_v19  ;;  %490 = vmatprep.mubr.bf16.mxu0 %v903_v28  ;;  %782 = vset.pattern.permute.xlu1 %v903_v28  ;;  %vm904_vm1 = vmmov 0   ;;  %v439_v31 = vld [vmem:[%s1182_s2] sm:$0xff] }
  0x43   : > { %v252_v6 = vunpack.c.0.s8 %v251_v4  ;;  %s901_s9 = smov 88   ;;  %s902_s10 = smov 87   ;;  %783 = vset.pattern.permute.xlu0 %v903_v28  ;;  %717 = vmatprep.mubr.msk.bf16.mxu1 %vm904_vm1, %v896_v14  ;;  %vm280_vm2 = vcmask 1039360   ;;  %vm291_vm3 = vcmask 1031168   ;;  %vm387_vm4 = vcmask 1041408  }
  0x44   : > { %s905_s11 = smov 86   ;;  %vm397_vm5 = vcmask 1043456   ;;  %vm301_vm6 = vcmask 883712   ;;  %vm404_vm7 = vcmask 1045504   ;;  %vm319_vm8 = vcmask 867328   ;;  %p1194_p12 = scmp.ne.s32.totalorder %s1189_s30, 0 }
  0x45   : > { %v255_v8 = vsub.s32 %v252_v6, %v1060_v5  ;;  %vm348_vm9 = vcmask 719872   ;;  %vm310_vm10 = vcmask 875520   ;;  %vm369_vm11 = vcmask 711680  }
  0x46   : > { %vm383_vm12 = vcmask 703488   ;;  %vm445_vm13 = vcmask 293888   ;;  %vm556_vm14 = vcmask 850944  }
  0x47   : > { %v272_v10 = vrot.slane %v265_v7, %v255_v8  ;;  %v1063_v11 = vrot.slane %v246_v1, %v255_v8  ;;  %v1066_v13 = vrot.slane %v249_v9, %v255_v8  ;;  %v330_v21 = vrot.slane %v247_v19, %v255_v8 }
  0x48   : > { %v337_v22 = vrot.slane %v323_v20, %v255_v8  ;;  %v359_v26 = vrot.slane %v352_v25, %v255_v8 }
  0x49   : > { %274 = vrot.lane.b32.xlu1 %v272_v10, %s895_s29  ;;  %278 = vrot.lane.b32.xlu0 %v1063_v11, %s895_s29  ;;  %v273_v12 = vcombine.high %v272_v10, %v272_v10  ;;  %v283_v15 = vcombine.low %v1063_v11, %v1063_v11  ;;  %v284_v16 = vcombine.low %v1066_v13, %v1066_v13 }
  0x4a   : > { %v264_v17 = vcombine.high %v1063_v11, %v1063_v11  ;;  %v294_v18 = vcombine.low %v272_v10, %v272_v10  ;;  %v338_v23 = vcombine.low %v330_v21, %v330_v21  ;;  %v339_v24 = vcombine.low %v337_v22, %v337_v22 }
  0x4b   : > { %v360_v27 = vcombine.low %v359_v26, %v359_v26  ;;  %v373_v29 = vcombine.high %v330_v21, %v330_v21  ;;  %v374_v30 = vcombine.high %v337_v22, %v337_v22 }
  0x4d   : > { %287 = vrot.lane.b32.xlu1 %v1063_v11, %s897_s26  ;;  %276 = vrot.lane.b32.xlu0 %v273_v12, %s895_s29  ;;  %s722_s29 = smul.u32 384, %s958_s22 }
  0x51   : > { %285 = vrot.lane.b32.xlu1 %v283_v15, %s897_s26  ;;  %289 = vrot.lane.b32.xlu0 %v284_v16, %s897_s26  ;;  %s615_s26 = sshll.u32 %s1053_s14, 4  ;;  %s616_s26 = int_to_ptr.vmem [resolvable:$true] %s615_s26 }
  0x55   : > { %299 = vrot.lane.b32.xlu1 %v283_v15, %s898_s28  ;;  %297 = vrot.lane.b32.xlu0 %v272_v10, %s898_s28 }
  0x59   : > { %306 = vrot.lane.b32.xlu1 %v264_v17, %s899_s8  ;;  %295 = vrot.lane.b32.xlu0 %v294_v18, %s898_s28 }
  0x5d   : > { %315 = vrot.lane.b32.xlu1 %v273_v12, %s900_s7  ;;  %308 = vrot.lane.b32.xlu0 %v1066_v13, %s899_s8 }
  0x61   : > { %304 = vrot.lane.b32.xlu1 %v1063_v11, %s899_s8  ;;  %317 = vrot.lane.b32.xlu0 %v1063_v11, %s900_s7 }
  0x65   : > { %342 = vrot.lane.b32.xlu1 %v330_v21, %s901_s9  ;;  %313 = vrot.lane.b32.xlu0 %v272_v10, %s900_s7  ;;  %s1136_s7 = scalar_lea.hbm %s1184_s4, %s722_s29 }
  0x69   : > { %340 = vrot.lane.b32.xlu1 %v338_v23, %s901_s9  ;;  %344 = vrot.lane.b32.xlu0 %v339_v24, %s901_s9 }
  0x6d   : > { %365 = vrot.lane.b32.xlu1 %v338_v23, %s902_s10  ;;  %363 = vrot.lane.b32.xlu0 %v359_v26, %s902_s10 }
  0x71   : > { %346 = vrot.lane.b32.xlu1 %v337_v22, %s901_s9  ;;  %361 = vrot.lane.b32.xlu0 %v360_v27, %s902_s10  ;;  %s601_s9 = scalar_lea.sflag [#allocation4], %s1042_s13 }
  0x75   : > { %375 = vrot.lane.b32.xlu1 %v330_v21, %s905_s11  ;;  %367 = vrot.lane.b32.xlu0 %v330_v21, %s902_s10  ;;  %s824_s10 = scalar_lea.vmem %s616_s26, 384 }
  0x76   : > { %p825_p6 = scmp.ne.s32.totalorder %s616_s26, %s824_s10 }
  0x78   : > { %p826_p13 = pnand %p825_p6, %p1194_p12 }
  0x79   : > { %379 = vrot.lane.b32.xlu1 %v337_v22, %s905_s11  ;;  %377 = vrot.lane.b32.xlu0 %v373_v29, %s905_s11 }
  0x7a   : > { %p827_p7 = pneg %p826_p13 }
  0x7d   : > { %381 = vrot.lane.b32.xlu0 %v374_v30, %s905_s11  ;;  %442 = vperm.xlu1 %782, %v439_v31   ;;  %s906_s11 = smov [#allocation5]  }
  0x7e   : > { %s828_s17 = sshll.u32 %s906_s11, 4  ;;  %s829_s17 = int_to_ptr.vmem [resolvable:$false] %s828_s17 }
  0x7f   : > { %s830_s23 = scalar_lea.vmem %s829_s17, 768  ;;  %p831_p10 = scmp.lt.s32.totalorder %s616_s26, %s829_s17 }
  0x80   : > { %p832_p2 = scmp.lt.s32.totalorder %s830_s23, %s824_s10 }
  0x82   : > { %p833_p4 = por %p832_p2, %p831_p10 }
  0x84   : > { %p834_p5 = pnand %p833_p4, %p827_p7 }
  0xbb   : > { %v275_v32 = vpop.permute.xlu1 %274  ;;  %v279_v33 = vpop.permute.xlu0 %278 }
  0xbc   : > { %v396_v40 = vsel %vm387_vm4, %v1066_v13, %v279_v33 }
  0xbf   : > { %v288_v34 = vpop.permute.xlu1 %287  ;;  %v277_v35 = vpop.permute.xlu0 %276 }
  0xc0   : > { %v282_v38 = vsel %vm280_vm2, %v277_v35, %v279_v33  ;;  %v281_v45 = vsel %vm280_vm2, %v275_v32, %v277_v35  ;;  %v438_v33 = vld [vmem:[%s1181_s1] sm:$0xf] }
  0xc1   : > { %v393_v41 = vsel %vm387_vm4, %v264_v17, %v282_v38  ;;  %v390_v51 = vsel %vm387_vm4, %v1063_v11, %v281_v45 }
  0xc3   : > { %v286_v36 = vpop.permute.xlu1 %285  ;;  %v290_v37 = vpop.permute.xlu0 %289 }
  0xc4   : > { %v293_v39 = vsel %vm291_vm3, %v288_v34, %v290_v37  ;;  %v403_v42 = vsel %vm397_vm5, %v396_v40, %v290_v37  ;;  %v292_v49 = vsel %vm291_vm3, %v286_v36, %v288_v34 }
  0xc5   : > { %v401_v48 = vsel %vm397_vm5, %v393_v41, %v293_v39  ;;  %v399_v55 = vsel %vm397_vm5, %v390_v51, %v292_v49  ;;  %v562_v51 = vsub.s32 0, %v1060_v5 }
  0xc7   : > { %v300_v43 = vpop.permute.xlu1 %299  ;;  %v298_v44 = vpop.permute.xlu0 %297 }
  0xc8   : > { %v303_v46 = vsel %vm301_vm6, %v298_v44, %v300_v43  ;;  %v412_v47 = vsel %vm404_vm7, %v403_v42, %v300_v43 }
  0xc9   : > { %712 = vmatpush3.bf16.msra.mxu1 %v412_v47  ;;  %v409_v50 = vsel %vm404_vm7, %v401_v48, %v303_v46 }
  0xca   : > { %458 = vmatprep.subr.bf16.mxu0 %v409_v50  ;;  %713 = vmatprep.subr.bf16.mxu1 %v896_v14 }
  0xcb   : > { %v307_v52 = vpop.permute.xlu1 %306  ;;  %v296_v53 = vpop.permute.xlu0 %295 }
  0xcc   : > { %v302_v54 = vsel %vm301_vm6, %v296_v53, %v298_v44  ;;  %v566_v53 = vsub.s32 1, %v1060_v5 }
  0xcd   : > { %v406_v56 = vsel %vm404_vm7, %v399_v55, %v302_v54  ;;  %v570_v55 = vsub.s32 2, %v1060_v5 }
  0xce   : > { %459 = vmatpush1.bf16.msra.mxu0 %v406_v56 }
  0xcf   : > { %v316_v57 = vpop.permute.xlu1 %315  ;;  %v309_v58 = vpop.permute.xlu0 %308 }
  0xd0   : > { %v312_v3 = vsel %vm310_vm10, %v307_v52, %v309_v58 }
  0xd3   : > { %v305_v59 = vpop.permute.xlu1 %304  ;;  %v318_v60 = vpop.permute.xlu0 %317 }
  0xd4   : > { %v321_v1 = vsel %vm319_vm8, %v316_v57, %v318_v60  ;;  %v311_v13 = vsel %vm310_vm10, %v305_v59, %v307_v52  ;;  %v422_v22 = vsel %vm387_vm4, %v309_v58, %v318_v60  ;;  %v558_v52 = vld [vmem:[%s1183_s3] sm:$0x7] }
  0xd5   : > { %v419_v4 = vsel %vm387_vm4, %v312_v3, %v321_v1  ;;  %v563_v59 = vrot.slane %v558_v52, %v562_v51 }
  0xd7   : > { %v343_v61 = vpop.permute.xlu1 %342  ;;  %v314_v62 = vpop.permute.xlu0 %313 }
  0xd8   : > { %v320_v8 = vsel %vm319_vm8, %v314_v62, %v316_v57  ;;  %v567_v62 = vrot.slane %v558_v52, %v566_v53 }
  0xd9   : > { %v416_v15 = vsel %vm387_vm4, %v311_v13, %v320_v8 }
  0xdb   : > { %v341_v63 = vpop.permute.xlu1 %340  ;;  %v345_v0 = vpop.permute.xlu0 %344 }
  0xdc   : > { %v350_v2 = vsel %vm348_vm9, %v343_v61, %v345_v0  ;;  %v349_v11 = vsel %vm348_vm9, %v341_v63, %v343_v61 }
  0xdd   : > { %v426_v10 = vsel %vm397_vm5, %v419_v4, %v350_v2  ;;  %v424_v19 = vsel %vm397_vm5, %v416_v15, %v349_v11  ;;  %v571_v2 = vrot.slane %v558_v52, %v570_v55 }
  0xdf   : > { %v366_v6 = vpop.permute.xlu1 %365  ;;  %v364_v7 = vpop.permute.xlu0 %363 }
  0xe0   : > { %v371_v9 = vsel %vm369_vm11, %v364_v7, %v366_v6 }
  0xe1   : > { %v433_v12 = vsel %vm404_vm7, %v426_v10, %v371_v9 }
  0xe2   : > { %460 = vmatprep.subr.bf16.mxu0 %v433_v12 }
  0xe3   : > { %v347_v16 = vpop.permute.xlu1 %346  ;;  %v362_v17 = vpop.permute.xlu0 %361 }
  0xe4   : > { %v370_v18 = vsel %vm369_vm11, %v362_v17, %v364_v7  ;;  %v351_v20 = vsel %vm348_vm9, %v345_v0, %v347_v16 }
  0xe5   : > { %v430_v21 = vsel %vm404_vm7, %v424_v19, %v370_v18  ;;  %v428_v26 = vsel %vm397_vm5, %v422_v22, %v351_v20 }
  0xe6   : > { %461 = vmatpush1.bf16.msra.mxu0 %v430_v21 }
  0xe7   : > { %v376_v23 = vpop.permute.xlu1 %375  ;;  %v368_v24 = vpop.permute.xlu0 %367 }
  0xe8   : > { %v372_v25 = vsel %vm369_vm11, %v366_v6, %v368_v24 }
  0xe9   : > { %v436_v27 = vsel %vm404_vm7, %v428_v26, %v372_v25 }
  0xea   : > { %714 = vmatpush3.bf16.msra.mxu1 %v436_v27 }
  0xeb   : > { %v380_v28 = vpop.permute.xlu1 %379  ;;  %v378_v29 = vpop.permute.xlu0 %377  ;;  %715 = vmatprep.subr.bf16.mxu1 %v896_v14 }
  0xec   : > { %v384_v30 = vsel %vm383_vm12, %v376_v23, %v378_v29  ;;  %v385_v31 = vsel %vm383_vm12, %v378_v29, %v380_v28 }
  0xed   : > { %700 = vmatprep.subr.msk.bf16.mxu0 %vm387_vm4, %v385_v31  ;;  %v450_v32 = vsel %vm387_vm4, %v384_v30, 0 }
  0xee   : > { %463 = vmatpush1.bf16.msra.mxu0 %v450_v32 }
  0xef   : > { %v382_v34 = vpop.permute.xlu0 %381 }
  0xf0   : > { %v386_v35 = vsel %vm383_vm12, %v380_v28, %v382_v34 }
  0xf1   : > { %701 = vmatmul.mubr.msk.bf16.vlgmr.msra.gmra.mrb[0].mxu0 %vm445_vm13, %v438_v33  ;;  %v456_v36 = vsel %vm387_vm4, %v386_v35, 0 }
  0xf2   : > { %716 = vmatpush3.bf16.msra.mxu1 %v456_v36 }
  0xf5   : > { %718 = vmatmul.mubr.msk.bf16.vlgmr.msra.gmra.mrb[0].mxu1 %vm445_vm13, %v438_v33 }
  0xfc   : > { %v443_v14 = vpop.permute.xlu1 %442 }
 0x1c4   : > { %v492_v37 = vpop.f32.mrb[0].mxu0 }
 0x1c5   : > { %v493_v38 = vadd.f32 %v492_v37, %v443_v14  ;;  %v494_v39 = vpop.f32.mrb[1].mxu0 }
 0x1c6   : > { %v495_v40 = vadd.f32 %v494_v39, %v443_v14  ;;  %v496_v41 = vpop.f32.mrb[2].mxu0 }
 0x1c7   : > { %v542_v42 = vmul.f32 0.70710677, %v493_v38  ;;  %v497_v43 = vpop.f32.mrb[3].mxu0  ;;  %v539_v57 = vmul.f32 0.5, %v493_v38 }
 0x1c8   : > { %v543_v44 = vmul.f32 0.70710677, %v495_v40  ;;  %v533_v45 = vpop.f32.mrb[0].mxu1  ;;  %v540_v60 = vmul.f32 0.5, %v495_v40 }
 0x1c9   : > { %788 = verf.f32 %v542_v42  ;;  %v534_v46 = vadd.f32 %v533_v45, %v443_v14  ;;  %v719_v47 = vpop.f32.mrb[1].mxu1 }
 0x1ca   : > { %790 = verf.f32 %v543_v44  ;;  %v536_v48 = vpop.f32.mrb[2].mxu1 }
 0x1cb   : > { %v544_v49 = vmul.f32 0.70710677, %v534_v46  ;;  %v720_v50 = vpop.f32.mrb[3].mxu1  ;;  %v541_v3 = vmul.f32 0.5, %v534_v46 }
 0x1cd   : > { %792 = verf.f32 %v544_v49 }
 0x1d3   : > { %v789_v54 = vpop.eup %788 }
 0x1d4   : > { %v791_v56 = vpop.eup %790  ;;  %v548_v58 = vadd.f32 1.0, %v789_v54 }
 0x1d5   : > { %v549_v61 = vadd.f32 1.0, %v791_v56 }
 0x1d6   : > { %v551_v63 = vmul.f32 %v548_v58, %v539_v57 }
 0x1d7   : > { %v793_v0 = vpop.eup %792  ;;  %v552_v1 = vmul.f32 %v549_v61, %v540_v60 }
 0x1d8   : > { %554 = vst [vmem:[%s1053_s14] sm:$0xff] %v551_v63  ;;  %v550_v4 = vadd.f32 1.0, %v793_v0  ;;  %v575_v6 = vmul.f32 %v563_v59, %v551_v63  ;;  %v583_v7 = vmul.f32 %v551_v63, %v551_v63 }
 0x1d9   : > { %555 = vst [vmem:[%s1053_s14 + $0x8] sm:$0xff] %v552_v1  ;;  %v576_v5 = vmul.f32 %v567_v62, %v552_v1  ;;  %v584_v8 = vmul.f32 %v552_v1, %v552_v1 }
 0x1da   : > { %v553_v9 = vmul.f32 %v550_v4, %v541_v3  ;;  %v586_v10 = vmul.f32 %v583_v7, %v563_v59 }
 0x1db   : > { %v578_v11 = vadd.f32 %v576_v5, %v575_v6  ;;  %v587_v12 = vmul.f32 %v584_v8, %v567_v62 }
 0x1dc   : > { %v577_v13 = vmul.f32 %v571_v2, %v553_v9  ;;  %557 = vst.msk [vmem:[%s1053_s14 + $0x10] sm:$0xff] %vm556_vm14, %v553_v9  ;;  %v585_v15 = vmul.f32 %v553_v9, %v553_v9 }
 0x1dd   : > { %v589_v16 = vadd.f32 %v587_v12, %v586_v10 }
 0x1de   : > { %v579_v17 = vsel %vm556_vm14, %v577_v13, 0.0  ;;  %v588_v18 = vmul.f32 %v585_v15, %v571_v2 }
 0x1df   : > { %v580_v19 = vadd.f32 %v579_v17, %v578_v11 }
 0x1e0   : > { %v590_v20 = vsel %vm556_vm14, %v588_v18, 0.0 }
 0x1e1   : > { %581 = vadd.xlane.f32.xlu0 %v580_v19  ;;  %v591_v21 = vadd.f32 %v590_v20, %v589_v16 }
 0x1e3   : > { %592 = vadd.xlane.f32.xlu1 %v591_v21 }
 0x1e4   : > { %837 = shalt.err (!%p834_p5)
}
 0x1e5   : > { %s838_s22 = scalar_lea.hbm %s1136_s7, 384  ;;  %s842_s25 = scalar_lea.hbm %s1184_s4, 768 }
 0x1e6   : > { %p839_p8 = scmp.ne.s32.totalorder %s1136_s7, %s838_s22  ;;  %p843_p1 = scmp.lt.u32.totalorder %s1136_s7, %s1184_s4 }
 0x1e7   : > { %p844_p3 = scmp.lt.u32.totalorder %s842_s25, %s838_s22  ;;  %p846_p6 = scmp.lt.u32.totalorder %s838_s22, %s1136_s7 }
 0x1e8   : > { %p840_p9 = pnand %p839_p8, %p1194_p12 }
 0x1e9   : > { %p845_p11 = por %p844_p3, %p843_p1 }
 0x1ea   : > { %p841_p0 = pneg %p840_p9 }
 0x1eb   : > { %p847_p13 = por %p846_p6, %p845_p11 }
 0x1ed   : > { %p848_p7 = pnand %p847_p13, %p841_p0 }
 0x1ef   : > { %851 = shalt.err (!%p848_p7)
}
 0x1f0   : > { %725 = dma.vmem_to_hbm [thread:$0]  (%p1194_p12), %s616_s26, 384, %s1136_s7, %s601_s9   ;;  %vm595_vm15 = vcmask 7168   ;;  %v594_v22 = vld [vmem:[%s1185_s5] sm:$0xff]  ;;  %vm598_vm0 = vcmask 15360  }
 0x26e   : > { %v582_v23 = vpop.xlane.xlu0 %581 }
 0x270   : > { %v593_v24 = vpop.xlane.xlu1 %592 }
 0x271   : > { %v596_v25 = vsel %vm595_vm15, %v582_v23, %v593_v24 }
 0x272   : > { %v597_v26 = vadd.f32 %v596_v25, %v594_v22 }
 0x274   : > { %599 = vst.msk [vmem:[%s1185_s5] sm:$0xff] %vm598_vm0, %v597_v26 }
 0x275 PF: > { %s633_s30 = sand.u32 1, %s878_s18   ;;  %p1195_p12 = scmp.ne.s32.totalorder %s1190_s6, 0 }
 0x276   : > { %p1196_p10 = scmp.ge.s32.totalorder %s890_s21, 2  ;;  %s634_s26 = scalar_lea.sflag [#allocation4], %s633_s30 }
 0x278   : > { %p732_p2 = pnand %p1196_p10, %p1195_p12 }
 0x27a   : > { %873 = dma.done.wait (!%p732_p2), %s634_s26, 384  }
 0x27b   : > { %875 = vsyncadd (!%p732_p2), %s634_s26, 4294966912  ;;  %p19_p4 = scmp.ge.s32.totalorder %s962_s24, 4   ;;  %s1197_s18 = smov %s882_s19 }
 0x27c   : > { %s1198_s19 = smov %s886_s20  ;;  %s1199_s20 = smov %s974_s27 }
 0x27d   : > { %s1200_s21 = smov %s962_s24  ;;  %21 = sbr.rel (!%p19_p4) target bundleno = 5 (0x5), region = 93 }
 0x284   :  { %639 = vsyncpa [#allocation3], 1 }
 0x285   :  { %641 = vsyncpa [#allocation3 + $0x1], 1 }
 0x286   :  { %642 = vsyncpa [#allocation4], 1 }
 0x287   :  { %644 = vsyncpa [#allocation4 + $0x1], 1 }

</bundles_post_ra>
